<compile_context>
chip_gen: v7x
topology: tpu7x:2x2x1
jax: 0.10.0
libtpu: 0.0.40
codegen_flags: <defaults>
</compile_context>

<pallas_src>
import jax
import jax.numpy as jnp
from jax import lax
from jax.experimental import pallas as pl
from jax.experimental.pallas import tpu as pltpu


def _attention_kernel(x_ref, w1_ref, b1_ref, wa1_ref, ba1_ref, wa2_ref, seg_ref,
                      m_ref, a_ref):
    """One grid step = Bt bags (R = Bt*N rows): x (R, F) -> m (Bt, L), a (1, R)."""
    f32 = jnp.float32
    x = x_ref[...]                                                    # (R, F) bf16

    # fc1: Linear(F -> L) (+ Dropout = identity) + ReLU.  w1 stays in torch
    # (out, in) = (L, F) layout; contract F-with-F on the MXU, f32 accumulate.
    h = lax.dot_general(x, w1_ref[...], (((1,), (1,)), ((), ())),
                        preferred_element_type=f32) + b1_ref[...]
    h = jnp.maximum(h, 0.0)                                           # (R, L) f32

    # attention[0..2]: Linear(L -> D) (+ Dropout) + Tanh.  wa1 is (D, L).
    t = jnp.tanh(
        lax.dot_general(h.astype(jnp.bfloat16), wa1_ref[...],
                        (((1,), (1,)), ((), ())),
                        preferred_element_type=f32) + ba1_ref[...])   # (R, D) f32

    # attention[3]: Linear(D -> 1), evaluated as (1,D) x (R,D)^T so the logits
    # come out lane-dense as (1, R).  The scalar bias ba2 is dropped: softmax
    # is shift-invariant, so it cannot change a or m.
    logits = lax.dot_general(wa2_ref[...], t.astype(jnp.bfloat16),
                             (((1,), (1,)), ((), ())),
                             preferred_element_type=f32)              # (1, R) f32

    # Per-bag softmax over contiguous groups of N lanes, via the 0/1 segment
    # matrix seg[b, r] = 1 iff row r belongs to bag b.  A single global max is
    # a valid (per-bag constant) stabilizer; normalization is an exact divide.
    e = jnp.exp(logits - jnp.max(logits, axis=-1, keepdims=True))     # (1, R)
    bag_sum = lax.dot_general(e, seg_ref[...], (((1,), (1,)), ((), ())),
                              preferred_element_type=f32)             # (1, Bt)
    inv = 1.0 / bag_sum                                               # exact
    inv_full = lax.dot_general(inv, seg_ref[...], (((1,), (0,)), ((), ())),
                               preferred_element_type=f32)            # (1, R)
    a = e * inv_full                                                  # (1, R)
    a_ref[...] = a                                                    # lane-dense store

    # Weighted pool per bag: mask attention rows to their bag and run one
    # (Bt, R) x (R, L) MXU matmul in f32 (user-visible output kept exact-ish).
    attn = seg_ref[...] * a                                           # (Bt, R)
    m_ref[...] = lax.dot_general(attn, h, (((1,), (0,)), ((), ())),
                                 preferred_element_type=f32)          # (Bt, L)


@jax.jit
def attention_aggregator_batched(x_bags, w1, b1, wa1, ba1, wa2, ba2):
    """Batched forward: x_bags (B, N, F) -> (m (B, L), a (B, N)).

    ba2 is accepted for API parity with the PyTorch module but is mathematically
    dead (softmax shift-invariance), so it is not fed to the kernel.
    """
    del ba2
    B, N, F = x_bags.shape
    L = w1.shape[0]
    D = wa1.shape[0]

    # Bags per grid step: fill ~256 MXU rows per step (v6e/v7x pass height,
    # also a multiple of 128 for v5e).  Large B automatically yields >= 2 grid
    # steps, which keeps both v7x TensorCores busy under "parallel" semantics.
    bt = max(1, min(B, 256 // N))
    steps = pl.cdiv(B, bt)
    b_pad = steps * bt
    r = bt * N                                    # rows per grid step

    x2 = x_bags.reshape(B * N, F)
    if b_pad != B:                                # pad whole (zero) bags only
        pad = jnp.zeros(((b_pad - B) * N, F), x2.dtype)
        x2 = jnp.concatenate([x2, pad], axis=0)
    x3 = x2.reshape(steps, r, F).astype(jnp.bfloat16)

    # 0/1 segment matrix: seg[b, r] = 1 iff flattened row r belongs to bag b.
    seg = (jnp.arange(r, dtype=jnp.int32)[None, :] // N
           == jnp.arange(bt, dtype=jnp.int32)[:, None]).astype(jnp.float32)

    m3, a3 = pl.pallas_call(
        _attention_kernel,
        grid=(steps,),
        in_specs=[
            pl.BlockSpec((None, r, F), lambda s: (s, 0, 0)),   # x: Bt bags / step
            pl.BlockSpec((L, F), lambda s: (0, 0)),            # w1  (out, in) bf16
            pl.BlockSpec((1, L), lambda s: (0, 0)),            # b1  f32
            pl.BlockSpec((D, L), lambda s: (0, 0)),            # wa1 (out, in) bf16
            pl.BlockSpec((1, D), lambda s: (0, 0)),            # ba1 f32
            pl.BlockSpec((1, D), lambda s: (0, 0)),            # wa2 row bf16
            pl.BlockSpec((bt, r), lambda s: (0, 0)),           # segment matrix
        ],
        out_specs=(
            pl.BlockSpec((None, bt, L), lambda s: (s, 0, 0)),  # m
            pl.BlockSpec((None, 1, r), lambda s: (s, 0, 0)),   # a (lane-dense row)
        ),
        out_shape=(
            jax.ShapeDtypeStruct((steps, bt, L), jnp.float32),
            jax.ShapeDtypeStruct((steps, 1, r), jnp.float32),
        ),
        compiler_params=pltpu.CompilerParams(
            dimension_semantics=("parallel",)),                # megacore / 2-TC
    )(
        x3,
        w1.astype(jnp.bfloat16),
        b1.reshape(1, L).astype(jnp.float32),
        wa1.astype(jnp.bfloat16),
        ba1.reshape(1, D).astype(jnp.float32),
        wa2.reshape(1, D).astype(jnp.bfloat16),
        seg,
    )
    m = m3.reshape(b_pad, L)[:B]
    a = a3.reshape(b_pad, N)[:B]
    return m, a


def attention_aggregator(x, w1, b1, wa1, ba1, wa2, ba2):
    """Module-equivalent forward: x (..., F) -> (m (1, L), a (1, N))."""
    F = w1.shape[1]
    x2 = x.reshape(-1, F)                  # torch: x.view(-1, in_features_size)
    return attention_aggregator_batched(x2[None], w1, b1, wa1, ba1, wa2, ba2)


def _reference(x2, w1, b1, wa1, ba1, wa2, ba2):
    """Pure-JAX f32 reference of the PyTorch module (eval mode)."""
    h = jnp.maximum(x2 @ w1.T + b1, 0.0)
    t = jnp.tanh(h @ wa1.T + ba1)
    logits = t @ wa2.T + ba2
    a = jax.nn.softmax(logits.T, axis=1)
    return a @ h, a


if __name__ == "__main__":
    in_features_size = 128    # F
    inner_feature_size = 128  # D
    out_feature_size = 256    # L

    key = jax.random.PRNGKey(0)
    kx, kb, kc, k1, k2, k3, k4, k5, k6 = jax.random.split(key, 9)

    # PyTorch nn.Linear layouts: W (out, in), b (out,)
    w1 = 0.05 * jax.random.normal(k1, (out_feature_size, in_features_size), jnp.float32)
    b1 = 0.05 * jax.random.normal(k2, (out_feature_size,), jnp.float32)
    wa1 = 0.05 * jax.random.normal(k3, (inner_feature_size, out_feature_size), jnp.float32)
    ba1 = 0.05 * jax.random.normal(k4, (inner_feature_size,), jnp.float32)
    wa2 = 0.05 * jax.random.normal(k5, (1, inner_feature_size), jnp.float32)
    ba2 = 0.05 * jax.random.normal(k6, (1,), jnp.float32)

    # Tolerances reflect bf16 MXU operands (f32 accumulation); normalization is exact.
    ATOL = RTOL = 2e-2

    # --- module-equivalent single-bag forward: x (2,4,128) -> one bag of N=8 ---
    x = jax.random.normal(kx, (2, 4, in_features_size), dtype=jnp.float32)
    m, a = attention_aggregator(x, w1, b1, wa1, ba1, wa2, ba2)
    jax.block_until_ready((m, a))
    m_ref, a_ref = _reference(x.reshape(-1, in_features_size), w1, b1, wa1, ba1, wa2, ba2)
    assert m.shape == (1, out_feature_size) and a.shape == (1, 8)
    assert jnp.allclose(jnp.sum(a, axis=1), 1.0, atol=1e-5)      # exact normalization
    assert jnp.allclose(m, m_ref, atol=ATOL, rtol=RTOL)
    assert jnp.allclose(a, a_ref, atol=ATOL, rtol=RTOL)

    # --- batched multi-bag forward: 64 bags of 8 -> 2 grid steps x 256 MXU rows ---
    B, N = 64, 8
    x_bags = jax.random.normal(kb, (B, N, in_features_size), dtype=jnp.float32)
    mb, ab = attention_aggregator_batched(x_bags, w1, b1, wa1, ba1, wa2, ba2)
    jax.block_until_ready((mb, ab))
    mb_ref, ab_ref = jax.vmap(
        lambda xb: _reference(xb, w1, b1, wa1, ba1, wa2, ba2))(x_bags)
    assert mb.shape == (B, out_feature_size) and ab.shape == (B, N)
    assert jnp.allclose(jnp.sum(ab, axis=1), 1.0, atol=1e-5)
    assert jnp.allclose(mb, mb_ref.reshape(B, -1), atol=ATOL, rtol=RTOL)
    assert jnp.allclose(ab, ab_ref.reshape(B, -1), atol=ATOL, rtol=RTOL)

    # --- non-divisible bag count: exercises whole-bag zero padding + slicing ---
    Bp = 40
    x_pad = jax.random.normal(kc, (Bp, N, in_features_size), dtype=jnp.float32)
    mp, ap = attention_aggregator_batched(x_pad, w1, b1, wa1, ba1, wa2, ba2)
    jax.block_until_ready((mp, ap))
    mp_ref, ap_ref = jax.vmap(
        lambda xb: _reference(xb, w1, b1, wa1, ba1, wa2, ba2))(x_pad)
    assert mp.shape == (Bp, out_feature_size) and ap.shape == (Bp, N)
    assert jnp.allclose(mp, mp_ref.reshape(Bp, -1), atol=ATOL, rtol=RTOL)
    assert jnp.allclose(ap, ap_ref.reshape(Bp, -1), atol=ATOL, rtol=RTOL)

    print("KERNEL_OK")
</pallas_src>

<mosaic_0001>
module attributes {stable_mosaic.version = 11 : i64} {
  func.func @_attention_kernel(%arg0: i32, %arg1: memref<1x8x128xbf16, #tpu.memory_space<vmem>>, %arg2: memref<256x128xbf16, #tpu.memory_space<vmem>>, %arg3: memref<1x256xf32, #tpu.memory_space<vmem>>, %arg4: memref<128x256xbf16, #tpu.memory_space<vmem>>, %arg5: memref<1x128xf32, #tpu.memory_space<vmem>>, %arg6: memref<1x128xbf16, #tpu.memory_space<vmem>>, %arg7: memref<1x8xf32, #tpu.memory_space<vmem>>, %arg8: memref<1x1x256xf32, #tpu.memory_space<vmem>>, %arg9: memref<1x1x8xf32, #tpu.memory_space<vmem>>) attributes {dimension_semantics = [#tpu.dimension_semantics<parallel>], iteration_bounds = array<i64: 1>, scalar_prefetch = 0 : i64, scratch_operands = 0 : i64, tpu.core_type = #tpu.core_type<tc>, window_params = [{transform_indices = @transform_0, window_bounds = array<i64: 1, 8, 128>}, {pipeline_mode = #tpu.pipeline_mode<synchronous>, transform_indices = @transform_1, window_bounds = array<i64: 256, 128>}, {pipeline_mode = #tpu.pipeline_mode<synchronous>, transform_indices = @transform_2, window_bounds = array<i64: 1, 256>}, {pipeline_mode = #tpu.pipeline_mode<synchronous>, transform_indices = @transform_3, window_bounds = array<i64: 128, 256>}, {pipeline_mode = #tpu.pipeline_mode<synchronous>, transform_indices = @transform_4, window_bounds = array<i64: 1, 128>}, {pipeline_mode = #tpu.pipeline_mode<synchronous>, transform_indices = @transform_5, window_bounds = array<i64: 1, 128>}, {pipeline_mode = #tpu.pipeline_mode<synchronous>, transform_indices = @transform_6, window_bounds = array<i64: 1, 8>}, {transform_indices = @transform_7, window_bounds = array<i64: 1, 1, 256>}, {transform_indices = @transform_8, window_bounds = array<i64: 1, 1, 8>}]} {
    %c0 = arith.constant 0 : index
    %c0_0 = arith.constant 0 : index
    %c0_1 = arith.constant 0 : index
    %0 = vector.load %arg1[%c0, %c0_0, %c0_1] : memref<1x8x128xbf16, #tpu.memory_space<vmem>>, vector<1x8x128xbf16>
    %1 = vector.shape_cast %0 : vector<1x8x128xbf16> to vector<8x128xbf16>
    %c0_2 = arith.constant 0 : index
    %c0_3 = arith.constant 0 : index
    %2 = vector.load %arg2[%c0_2, %c0_3] : memref<256x128xbf16, #tpu.memory_space<vmem>>, vector<256x128xbf16>
    %cst = arith.constant dense<0.000000e+00> : vector<8x256xf32>
    %3 = tpu.matmul %1, %2, %cst {dimension_numbers = #tpu.dot_dimension_numbers<[1], [1], [0], [0], [0, 0, 1, 0], [], []>} : vector<8x128xbf16>, vector<256x128xbf16>, vector<8x256xf32> -> vector<8x256xf32>
    %c0_4 = arith.constant 0 : index
    %c0_5 = arith.constant 0 : index
    %4 = vector.load %arg3[%c0_4, %c0_5] : memref<1x256xf32, #tpu.memory_space<vmem>>, vector<1x256xf32>
    %5 = vector.broadcast %4 : vector<1x256xf32> to vector<8x256xf32>
    %6 = arith.addf %3, %5 : vector<8x256xf32>
    %cst_6 = arith.constant 0.000000e+00 : f32
    %7 = vector.broadcast %cst_6 : f32 to vector<8x256xf32>
    %8 = arith.maximumf %6, %7 : vector<8x256xf32>
    %9 = arith.truncf %8 : vector<8x256xf32> to vector<8x256xbf16>
    %c0_7 = arith.constant 0 : index
    %c0_8 = arith.constant 0 : index
    %10 = vector.load %arg4[%c0_7, %c0_8] : memref<128x256xbf16, #tpu.memory_space<vmem>>, vector<128x256xbf16>
    %cst_9 = arith.constant dense<0.000000e+00> : vector<8x128xf32>
    %11 = tpu.matmul %9, %10, %cst_9 {dimension_numbers = #tpu.dot_dimension_numbers<[1], [1], [0], [0], [0, 0, 1, 0], [], []>} : vector<8x256xbf16>, vector<128x256xbf16>, vector<8x128xf32> -> vector<8x128xf32>
    %c0_10 = arith.constant 0 : index
    %c0_11 = arith.constant 0 : index
    %12 = vector.load %arg5[%c0_10, %c0_11] : memref<1x128xf32, #tpu.memory_space<vmem>>, vector<1x128xf32>
    %13 = vector.broadcast %12 : vector<1x128xf32> to vector<8x128xf32>
    %14 = arith.addf %11, %13 : vector<8x128xf32>
    %15 = math.tanh %14 : vector<8x128xf32>
    %c0_12 = arith.constant 0 : index
    %c0_13 = arith.constant 0 : index
    %16 = vector.load %arg6[%c0_12, %c0_13] : memref<1x128xbf16, #tpu.memory_space<vmem>>, vector<1x128xbf16>
    %17 = arith.truncf %15 : vector<8x128xf32> to vector<8x128xbf16>
    %cst_14 = arith.constant dense<0.000000e+00> : vector<1x8xf32>
    %18 = tpu.matmul %16, %17, %cst_14 {dimension_numbers = #tpu.dot_dimension_numbers<[1], [1], [0], [0], [0, 0, 1, 0], [], []>} : vector<1x128xbf16>, vector<8x128xbf16>, vector<1x8xf32> -> vector<1x8xf32>
    %cst_15 = arith.constant dense<0xFF800000> : vector<1xf32>
    %19 = vector.multi_reduction <maximumf>, %18, %cst_15 [1] : vector<1x8xf32> to vector<1xf32>
    %20 = vector.shape_cast %19 : vector<1xf32> to vector<1x1xf32>
    %21 = vector.broadcast %20 : vector<1x1xf32> to vector<1x8xf32>
    %22 = arith.subf %18, %21 : vector<1x8xf32>
    %23 = math.exp %22 : vector<1x8xf32>
    %c0_16 = arith.constant 0 : index
    %c0_17 = arith.constant 0 : index
    %24 = vector.load %arg7[%c0_16, %c0_17] : memref<1x8xf32, #tpu.memory_space<vmem>>, vector<1x8xf32>
    %cst_18 = arith.constant dense<0.000000e+00> : vector<1x1xf32>
    %25 = tpu.matmul %23, %24, %cst_18 {dimension_numbers = #tpu.dot_dimension_numbers<[1], [1], [0], [0], [0, 0, 1, 0], [], []>} : vector<1x8xf32>, vector<1x8xf32>, vector<1x1xf32> -> vector<1x1xf32>
    %cst_19 = arith.constant 1.000000e+00 : f32
    %26 = vector.broadcast %cst_19 : f32 to vector<1x1xf32>
    %27 = arith.divf %26, %25 : vector<1x1xf32>
    %c0_20 = arith.constant 0 : index
    %c0_21 = arith.constant 0 : index
    %28 = vector.load %arg7[%c0_20, %c0_21] : memref<1x8xf32, #tpu.memory_space<vmem>>, vector<1x8xf32>
    %cst_22 = arith.constant dense<0.000000e+00> : vector<1x8xf32>
    %29 = tpu.matmul %27, %28, %cst_22 {dimension_numbers = #tpu.dot_dimension_numbers<[1], [0], [0], [1], [0, 0, 1, 1], [], []>} : vector<1x1xf32>, vector<1x8xf32>, vector<1x8xf32> -> vector<1x8xf32>
    %30 = arith.mulf %23, %29 : vector<1x8xf32>
    %c0_23 = arith.constant 0 : index
    %c0_24 = arith.constant 0 : index
    %c0_25 = arith.constant 0 : index
    %31 = vector.load %arg9[%c0_23, %c0_24, %c0_25] : memref<1x1x8xf32, #tpu.memory_space<vmem>>, vector<1x1x8xf32>
    %32 = vector.shape_cast %31 : vector<1x1x8xf32> to vector<1x8xf32>
    %33 = vector.shape_cast %30 : vector<1x8xf32> to vector<1x1x8xf32>
    tpu.vector_store %arg9[%c0_23, %c0_24, %c0_25], %33 {strides = array<i32>} : memref<1x1x8xf32, #tpu.memory_space<vmem>>, vector<1x1x8xf32>,
    %c0_26 = arith.constant 0 : index
    %c0_27 = arith.constant 0 : index
    %34 = vector.load %arg7[%c0_26, %c0_27] : memref<1x8xf32, #tpu.memory_space<vmem>>, vector<1x8xf32>
    %35 = arith.mulf %34, %30 : vector<1x8xf32>
    %cst_28 = arith.constant dense<0.000000e+00> : vector<1x256xf32>
    %36 = tpu.matmul %35, %8, %cst_28 {dimension_numbers = #tpu.dot_dimension_numbers<[1], [0], [0], [1], [0, 0, 1, 1], [], []>} : vector<1x8xf32>, vector<8x256xf32>, vector<1x256xf32> -> vector<1x256xf32>
    %c0_29 = arith.constant 0 : index
    %c0_30 = arith.constant 0 : index
    %c0_31 = arith.constant 0 : index
    %37 = vector.load %arg8[%c0_29, %c0_30, %c0_31] : memref<1x1x256xf32, #tpu.memory_space<vmem>>, vector<1x1x256xf32>
    %38 = vector.shape_cast %37 : vector<1x1x256xf32> to vector<1x256xf32>
    %39 = vector.shape_cast %36 : vector<1x256xf32> to vector<1x1x256xf32>
    tpu.vector_store %arg8[%c0_29, %c0_30, %c0_31], %39 {strides = array<i32>} : memref<1x1x256xf32, #tpu.memory_space<vmem>>, vector<1x1x256xf32>,
    return
  }
  func.func @transform_0(%arg0: i32) -> (i32, i32, i32) {
    %c0_i32 = arith.constant 0 : i32
    %c0_i32_0 = arith.constant 0 : i32
    %c0_i32_1 = arith.constant 0 : i32
    return %arg0, %c0_i32, %c0_i32_0 : i32, i32, i32
  }
  func.func @transform_1(%arg0: i32) -> (i32, i32) {
    %c0_i32 = arith.constant 0 : i32
    %c0_i32_0 = arith.constant 0 : i32
    %c0_i32_1 = arith.constant 0 : i32
    return %c0_i32, %c0_i32_0 : i32, i32
  }
  func.func @transform_2(%arg0: i32) -> (i32, i32) {
    %c0_i32 = arith.constant 0 : i32
    %c0_i32_0 = arith.constant 0 : i32
    %c0_i32_1 = arith.constant 0 : i32
    return %c0_i32, %c0_i32_0 : i32, i32
  }
  func.func @transform_3(%arg0: i32) -> (i32, i32) {
    %c0_i32 = arith.constant 0 : i32
    %c0_i32_0 = arith.constant 0 : i32
    %c0_i32_1 = arith.constant 0 : i32
    return %c0_i32, %c0_i32_0 : i32, i32
  }
  func.func @transform_4(%arg0: i32) -> (i32, i32) {
    %c0_i32 = arith.constant 0 : i32
    %c0_i32_0 = arith.constant 0 : i32
    %c0_i32_1 = arith.constant 0 : i32
    return %c0_i32, %c0_i32_0 : i32, i32
  }
  func.func @transform_5(%arg0: i32) -> (i32, i32) {
    %c0_i32 = arith.constant 0 : i32
    %c0_i32_0 = arith.constant 0 : i32
    %c0_i32_1 = arith.constant 0 : i32
    return %c0_i32, %c0_i32_0 : i32, i32
  }
  func.func @transform_6(%arg0: i32) -> (i32, i32) {
    %c0_i32 = arith.constant 0 : i32
    %c0_i32_0 = arith.constant 0 : i32
    %c0_i32_1 = arith.constant 0 : i32
    return %c0_i32, %c0_i32_0 : i32, i32
  }
  func.func @transform_7(%arg0: i32) -> (i32, i32, i32) {
    %c0_i32 = arith.constant 0 : i32
    %c0_i32_0 = arith.constant 0 : i32
    %c0_i32_1 = arith.constant 0 : i32
    return %arg0, %c0_i32, %c0_i32_0 : i32, i32, i32
  }
  func.func @transform_8(%arg0: i32) -> (i32, i32, i32) {
    %c0_i32 = arith.constant 0 : i32
    %c0_i32_0 = arith.constant 0 : i32
    %c0_i32_1 = arith.constant 0 : i32
    return %arg0, %c0_i32, %c0_i32_0 : i32, i32, i32
  }
}

</mosaic_0001>

<bundles_post_ra>
// kernel: attention_aggregator_batched.1
= control target key start
LH: loop header
LB: loop body
LE: loop exit
PB: predicated region body
PF: predicated region fallthrough
CT: control target
= control target key end

     0   :  { %14 = vsyncpa [#allocation3], 0  ;;  %s991_s0 = inlined_call_operand.vmem [shape: bf16[1,8,128], index: 0, kind: input, shape index: {}]   ;;  %s992_s1 = inlined_call_operand.vmem [shape: bf16[256,128], index: 1, kind: input, shape index: {}]   ;;  %s993_s2 = inlined_call_operand.vmem [shape: f32[1,256], index: 2, kind: input, shape index: {}]   ;;  %s994_s3 = inlined_call_operand.vmem [shape: bf16[128,256], index: 3, kind: input, shape index: {}]   ;;  %s995_s4 = inlined_call_operand.vmem [shape: f32[1,128], index: 4, kind: input, shape index: {}]   ;;  %s996_s5 = inlined_call_operand.vmem [shape: bf16[1,128], index: 5, kind: input, shape index: {}]   ;;  %s997_s6 = inlined_call_operand.vmem [shape: f32[1,8], index: 6, kind: input, shape index: {}]   ;;  %s998_s7 = inlined_call_operand.hbm [shape: f32[1,1,256], index: 7, kind: output, shape index: {0}]   ;;  %s999_s8 = inlined_call_operand.hbm [shape: f32[1,1,8], index: 8, kind: output, shape index: {1}]  }
   0x1   :  { %v699_v0 = vld [vmem:[%s992_s1 + $0x40] sm:$0xff]   ;;  %v701_v2 = vld [vmem:[%s992_s1 + $0x48] sm:$0xff]   ;;  %v703_v4 = vld [vmem:[%s992_s1 + $0x50] sm:$0xff]  }
   0x2   :  { %v700_v1 = vld [vmem:[%s992_s1] sm:$0xff]   ;;  %661 = vmatprep.subr.bf16.mxu0 %v699_v0  ;;  %v702_v3 = vld [vmem:[%s992_s1 + $0x8] sm:$0xff]   ;;  %v704_v5 = vld [vmem:[%s992_s1 + $0x10] sm:$0xff]  }
   0x3   :  { %662 = vmatpush3.bf16.xpose.msra.mxu0 %v700_v1  ;;  %v705_v6 = vld [vmem:[%s992_s1 + $0x58] sm:$0xff]   ;;  %v31_v7 = vld [vmem:[%s991_s0] sm:$0xf]  ;;  %v715_v8 = vld [vmem:[%s994_s3 + $0x4] ss:$8 sps:$4 sm:$0xff]  }
   0x4   :  { %663 = vmatprep.subr.bf16.mxu0 %v701_v2  ;;  %677 = vmatprep.mubr.bf16.mxu0 %v31_v7  ;;  %v717_v9 = vld [vmem:[%s994_s3] ss:$8 sps:$4 sm:$0xff]   ;;  %v718_v10 = vld [vmem:[%s994_s3 + $0x14] ss:$8 sps:$4 sm:$0xff]   ;;  %v720_v13 = vld [vmem:[%s994_s3 + $0x10] ss:$8 sps:$4 sm:$0xff]  }
   0x5   :  { %320 = vmatprep.subr.bf16.mxu1 %v715_v8  ;;  %v706_v11 = vld [vmem:[%s992_s1 + $0x18] sm:$0xff]   ;;  %v707_v12 = vld [vmem:[%s992_s1 + $0x60] sm:$0xff]  }
   0x6   :  { %321 = vmatpush1.bf16.xpose.msra.mxu1 %v717_v9  ;;  %v721_v14 = vld [vmem:[%s994_s3 + $0x24] ss:$8 sps:$4 sm:$0xff]  }
   0x7   :  { %322 = vmatprep.subr.bf16.mxu1 %v718_v10 }
   0xb   :  { %664 = vmatpush3.bf16.xpose.msra.mxu0 %v702_v3 }
   0xc   :  { %665 = vmatprep.subr.bf16.mxu0 %v703_v4 }
  0x13   :  { %666 = vmatpush3.bf16.xpose.msra.mxu0 %v704_v5 }
  0x14   :  { %667 = vmatprep.subr.bf16.mxu0 %v705_v6 }
  0x15   :  { %15 = vsyncpa [#allocation5], 0  ;;  %323 = vmatpush1.bf16.xpose.msra.mxu1 %v720_v13  ;;  %v708_v15 = vld [vmem:[%s992_s1 + $0x20] sm:$0xff]   ;;  %v709_v16 = vld [vmem:[%s992_s1 + $0x68] sm:$0xff]   ;;  %v793_v33 = vmov 0.0   ;;  %v66_v34 = vlaneseq  ;;  %vm421_vm0 = vcmask 1040384  }
  0x16   :  { %324 = vmatprep.subr.bf16.mxu1 %v721_v14  ;;  %v723_v17 = vld [vmem:[%s994_s3 + $0x20] ss:$8 sps:$4 sm:$0xff]   ;;  %v724_v18 = vld [vmem:[%s994_s3 + $0x34] ss:$8 sps:$4 sm:$0xff]   ;;  %v726_v21 = vld [vmem:[%s994_s3 + $0x30] ss:$8 sps:$4 sm:$0xff]  }
  0x17   :  { %v710_v19 = vld [vmem:[%s992_s1 + $0x28] sm:$0xff]   ;;  %v711_v20 = vld [vmem:[%s992_s1 + $0x70] sm:$0xff]   ;;  %v713_v24 = vld [vmem:[%s992_s1 + $0x78] sm:$0xff]   ;;  %v943_v35 = vshrl.u32 %v66_v34, 7  ;;  %vm794_vm1 = vmmov 0   ;;  %vm403_vm2 = vcmask 57344  }
  0x18   :  { %v727_v22 = vld [vmem:[%s994_s3 + $0x44] ss:$8 sps:$4 sm:$0xff]   ;;  %v712_v23 = vld [vmem:[%s992_s1 + $0x30] sm:$0xff]   ;;  %v729_v25 = vld [vmem:[%s994_s3 + $0x40] ss:$8 sps:$4 sm:$0xff]   ;;  %vm417_vm3 = vcmask 7168  }
  0x19   :  { %v730_v26 = vld [vmem:[%s994_s3 + $0x54] ss:$8 sps:$4 sm:$0xff]   ;;  %v732_v28 = vld [vmem:[%s994_s3 + $0x50] ss:$8 sps:$4 sm:$0xff]   ;;  %v733_v29 = vld [vmem:[%s994_s3 + $0x64] ss:$8 sps:$4 sm:$0xff]  }
  0x1a   :  { %v714_v27 = vld [vmem:[%s992_s1 + $0x38] sm:$0xff]   ;;  %v735_v30 = vld [vmem:[%s994_s3 + $0x60] ss:$8 sps:$4 sm:$0xff]   ;;  %v68_v36 = vsub.s32 0, %v943_v35  ;;  %v72_v38 = vsub.s32 1, %v943_v35  ;;  %vm499_vm4 = vcmask 64512  }
  0x1b   :  { %668 = vmatpush3.bf16.xpose.msra.mxu0 %v706_v11  ;;  %v736_v31 = vld [vmem:[%s994_s3 + $0x74] ss:$8 sps:$4 sm:$0xff]   ;;  %v738_v32 = vld [vmem:[%s994_s3 + $0x70] ss:$8 sps:$4 sm:$0xff]   ;;  %v64_v37 = vld [vmem:[%s993_s2] sm:$0x3] }
  0x1c   :  { %669 = vmatprep.subr.bf16.mxu0 %v707_v12  ;;  %v69_v39 = vrot.slane %v64_v37, %v68_v36  ;;  %v73_v40 = vrot.slane %v64_v37, %v72_v38  ;;  %v410_v51 = vld [vmem:[%s997_s6] sm:$0x1]  ;;  %s795_s29 = smov [#allocation4]  }
  0x1d   :  { %325 = vmatpush1.bf16.xpose.msra.mxu1 %v723_v17  ;;  %v641_v52 = vld [vmem:[%s995_s4] ss:$0 sm:$0xff]  ;;  %s613_s30 = sshll.u32 %s795_s29, 4  ;;  %s614_s30 = int_to_ptr.vmem [resolvable:$true] %s613_s30 }
  0x1e   :  { %326 = vmatprep.subr.bf16.mxu1 %v724_v18  ;;  %v361_v60 = vld [vmem:[%s996_s5] sm:$0x1]  ;;  %s745_s9 = scalar_lea.vmem %s614_s30, 16  ;;  %s749_s10 = scalar_lea.vmem %s614_s30, 32 }
  0x1f   :  { %v497_v11 = vld [vmem:[%s997_s6] sm:$0x1]  ;;  %p746_p0 = scmp.ne.s32.totalorder %s614_s30, %s745_s9  ;;  %p750_p1 = scmp.lt.s32.totalorder %s614_s30, %s614_s30 }
  0x20   :  { %p751_p2 = scmp.lt.s32.totalorder %s749_s10, %s745_s9 }
  0x22   :  { %p752_p3 = por %p751_p2, %p750_p1 }
  0x23   :  { %670 = vmatpush3.bf16.xpose.msra.mxu0 %v708_v15 }
  0x24   :  { %671 = vmatprep.subr.bf16.mxu0 %v709_v16  ;;  %p753_p4 = pnand %p752_p3, %p746_p0 }
  0x25   :  { %327 = vmatpush1.bf16.xpose.msra.mxu1 %v726_v21 }
  0x26   :  { %328 = vmatprep.subr.bf16.mxu1 %v727_v22 }
  0x2b   :  { %672 = vmatpush3.bf16.xpose.msra.mxu0 %v710_v19 }
  0x2c   :  { %673 = vmatprep.subr.bf16.mxu0 %v711_v20 }
  0x2d   :  { %329 = vmatpush1.bf16.xpose.msra.mxu1 %v729_v25 }
  0x2e   :  { %330 = vmatprep.subr.bf16.mxu1 %v730_v26 }
  0x33   :  { %674 = vmatpush3.bf16.xpose.msra.mxu0 %v712_v23 }
  0x34   :  { %675 = vmatprep.subr.bf16.mxu0 %v713_v24 }
  0x35   :  { %331 = vmatpush1.bf16.xpose.msra.mxu1 %v732_v28 }
  0x36   :  { %332 = vmatprep.subr.bf16.mxu1 %v733_v29 }
  0x3b   :  { %676 = vmatpush3.bf16.xpose.msra.mxu0 %v714_v27 }
  0x3c   :  { %683 = vmatprep.subr.bf16.mxu0 %v793_v33 }
  0x3d   :  { %333 = vmatpush1.bf16.xpose.msra.mxu1 %v735_v30 }
  0x3e   :  { %334 = vmatprep.subr.bf16.mxu1 %v736_v31 }
  0x42   :  { %678 = vmatmul.mubr.bf16.vlgmr.msra.gmra.mrb[0].mxu0 %v31_v7 }
  0x43   :  { %685 = vmatprep.mubr.msk.bf16.mxu0 %vm794_vm1, %v793_v33 }
  0x45   :  { %335 = vmatpush1.bf16.xpose.msra.mxu1 %v738_v32 }
  0x46   :  { %689 = vmatprep.subr.mxu1 %v793_v33 }
 0x115   :  { %v206_v41 = vpop.f32.mrb[0].mxu0 }
 0x116   :  { %v207_v42 = vadd.f32 %v206_v41, %v69_v39  ;;  %v208_v43 = vpop.f32.mrb[1].mxu0 }
 0x117   :  { %v209_v44 = vadd.f32 %v208_v43, %v73_v40  ;;  %v210_v45 = vpop.f32.mrb[2].mxu0 }
 0x118   :  { %v213_v46 = vmax.f32 %v207_v42, 0.0  ;;  %v211_v47 = vpop.f32.mrb[3].mxu0 }
 0x119   :  { %v214_v48 = vmax.f32 %v209_v44, 0.0 }
 0x11a   :  { %v215_v50 = vpack.c.bf16 %v213_v46, %v213_v46 }
 0x11b   :  { %v216_v49 = vpack.c.bf16 %v214_v48, %v214_v48 }
 0x11d   :  { %352 = vmatprep.mubr.bf16.mxu1 %v216_v49 }
 0x11e   :  { %353 = vmatmul.mubr.bf16.vlgmr.msra.gmra.mrb[0].mxu1 %v215_v50 }
 0x11f   :  { %690 = vmatpush3.msk.msra.mxu1 %vm421_vm0, %v410_v51  ;;  %691 = vmatprep.mubr.msk.f32.mxu1 %vm794_vm1, %v793_v33 }
 0x120   :  { %503 = vmatprep.subr.mxu1 %v214_v48 }
 0x1f1   :  { %v354_v53 = vpop.f32.mrb[0].mxu1 }
 0x1f2   :  { %v355_v54 = vadd.f32 %v641_v52, %v354_v53  ;;  %v356_v55 = vpop.f32.mrb[1].mxu1 }
 0x1f3   :  { %v357_v56 = vpop.f32.mrb[2].mxu1 }
 0x1f4   :  { %739 = vtanh.f32 %v355_v54  ;;  %v358_v57 = vpop.f32.mrb[3].mxu1 }
 0x1fe   :  { %v740_v58 = vpop.eup %739 }
 0x1ff   :  { %v362_v59 = vpack.c.bf16 %v740_v58, %v740_v58 }
 0x201   :  { %684 = vmatpush3.bf16.xpose.msra.mxu0 %v362_v59 }
 0x208   :  { %686 = vmatmul.mubr.bf16.vlgmr.msra.gmra.mrb[4].mxu0 %v361_v60 }
 0x2db   :  { %v397_v61 = vpop.f32.mrb[4].mxu0 }
 0x2dc   :  { %v687_v62 = vpop.f32.mrb[5].mxu0  ;;  %v404_v63 = vsel %vm403_vm2, %v397_v61, -inf }
 0x2dd   :  { %405 = vmax.xlane.f32.xlu0 %v404_v63  ;;  %v400_v0 = vpop.f32.mrb[6].mxu0 }
 0x2de   :  { %v688_v1 = vpop.f32.mrb[7].mxu0 }
 0x36a   :  { %v406_v2 = vpop.xlane.xlu0 %405 }
 0x36b   :  { %v407_v3 = vsub.f32 %v397_v61, %v406_v2 }
 0x36d   :  { %v408_v4 = vmul.f32 1.442695, %v407_v3 }
 0x36f   :  { %741 = vpow2.f32 %v408_v4 }
 0x379   :  { %v742_v5 = vpop.eup %741 }
 0x37a   :  { %v411_v6 = vmul.f32 %v742_v5, %v410_v51 }
 0x37c   :  { %v412_v7 = vsel %vm403_vm2, %v411_v6, 0.0 }
 0x37d   :  { %413 = vadd.xlane.f32.xlu0 %v412_v7 }
 0x40a   :  { %v414_v8 = vpop.xlane.xlu0 %413 }
 0x40b   :  { %743 = vrcp.f32 %v414_v8 }
 0x415   :  { %v744_v9 = vpop.eup %743 }
 0x416   :  { %692 = vmatmul.mubr.msk.f32.vlgmr.msra.gmra.mrb[4].mxu1 %vm417_vm3, %v744_v9 }
 0x417   :  { %504 = vmatpush1.msra.mxu1 %v213_v46  ;;  %567 = vmatprep.mubr.f32.mxu1 %v793_v33 }
 0x4e9   :  { %v491_v10 = vpop.f32.mrb[4].mxu1 }
 0x4ea   :  { %v495_v12 = vmul.f32 %v742_v5, %v491_v10  ;;  %v693_v13 = vpop.f32.mrb[5].mxu1 }
 0x4ec   :  { %v498_v14 = vmul.f32 %v497_v11, %v495_v12  ;;  %496 = vst.msk [vmem:[#allocation4] sm:$0x1] %vm403_vm2, %v495_v12 }
 0x4ee   :  { %660 = vmatmul.mubr.msk.f32.vlgmr.msra.gmra.mrb[6].mxu1 %vm499_vm4, %v498_v14 }
 0x4ef   :  { %756 = shalt.err (!%p753_p4)
}
 0x4f0   :  { %s757_s12 = scalar_lea.hbm %s999_s8, 16 }
 0x4f1   :  { %p758_p5 = scmp.ne.s32.totalorder %s999_s8, %s757_s12  ;;  %p761_p6 = scmp.lt.u32.totalorder %s757_s12, %s999_s8 }
 0x4f3   :  { %p763_p7 = pnand %p761_p6, %p758_p5 }
 0x4f5   :  { %766 = shalt.err (!%p763_p7)
}
 0x4f6   :  { %616 = dma.vmem_to_hbm [thread:$0]  %s614_s30, 16, %s999_s8, [#allocation5]   ;;  %v796_v15 = vmov 1966171168   ;;  %vm594_vm5 = vcmp.lt.s32.totalorder %v66_v34, 256 }
 0x4f7   :  { %v578_v16 = vunpack.c.l.s4 %v796_v15  ;;  %s797_s19 = smov [#allocation2]  }
 0x4f8   :  { %s603_s20 = sshll.u32 %s797_s19, 4  ;;  %s604_s20 = int_to_ptr.vmem [resolvable:$true] %s603_s20 }
 0x4f9   :  { %v579_v17 = vunpack.c.0.s8 %v578_v16  ;;  %s767_s21 = scalar_lea.vmem %s604_s20, 32  ;;  %p772_p9 = scmp.lt.s32.totalorder %s604_s20, %s604_s20 }
 0x4fa   :  { %p768_p8 = scmp.ne.s32.totalorder %s604_s20, %s767_s21  ;;  %p773_p10 = scmp.lt.s32.totalorder %s767_s21, %s767_s21 }
 0x4fb   :  { %v582_v19 = vsub.s32 %v579_v17, %v943_v35 }
 0x4fc   :  { %p774_p11 = por %p773_p10, %p772_p9 }
 0x4fe   :  { %p775_p12 = pnand %p774_p11, %p768_p8 }
 0x5c1   :  { %v569_v18 = vpop.f32.mrb[6].mxu1 }
 0x5c2   :  { %v571_v20 = vpop.f32.mrb[7].mxu1 }
 0x5c3   :  { %v576_v21 = vcombine.low %v569_v18, %v571_v20 }
 0x5c5   :  { %v583_v22 = vrot.slane %v576_v21, %v582_v19 }
 0x5c7   :  { %v590_v23 = vrot.slane %v583_v22, %v582_v19 }
 0x5c9   :  { %596 = vst.msk [vmem:[#allocation2] sm:$0x3] %vm594_vm5, %v590_v23 }
 0x5ca   :  { %778 = shalt.err (!%p775_p12)
}
 0x5cb   :  { %s779_s1 = scalar_lea.hbm %s998_s7, 32 }
 0x5cc   :  { %p780_p13 = scmp.ne.s32.totalorder %s998_s7, %s779_s1  ;;  %p783_p0 = scmp.lt.u32.totalorder %s779_s1, %s998_s7 }
 0x5ce   :  { %p785_p1 = pnand %p783_p0, %p780_p13 }
 0x5d0   :  { %788 = shalt.err (!%p785_p1)
}
 0x5d1   :  { %606 = dma.vmem_to_hbm [thread:$0]  %s604_s20, 32, %s998_s7, [#allocation3]  }
 0x5d2   :  { %789 = dma.done.wait [#allocation3], 32  }
 0x5d3   :  { %790 = vsyncadd [#allocation3], 4294967264 }
 0x5d4   :  { %791 = dma.done.wait [#allocation5], 16  }
 0x5d5   :  { %792 = vsyncadd [#allocation5], 4294967280 }
 0x5d6   :  { %623 = vsyncpa [#allocation3], 1 }
 0x5d7   :  { %624 = vsyncpa [#allocation5], 1 }

</bundles_post_ra>
